<compile_context>
chip_gen: v6e
topology: v6e:2x2x1
jax: 0.10.0
libtpu: 0.0.40
codegen_flags: <defaults>
</compile_context>

<pallas_src>
import functools

import jax
import jax.numpy as jnp
from jax.experimental import pallas as pl
from jax.experimental.pallas import tpu as pltpu

_LANE = 128


def _layernorm_kernel(x_ref, a_ref, b_ref, o_ref, *, eps, feat, feat_pad):
    # x_ref: (row_tile, feat_pad); a_ref/b_ref: (1, feat_pad) f32; o_ref like x_ref.
    x = x_ref[...].astype(jnp.float32)

    s = jnp.sum(x, axis=-1, keepdims=True)
    mean = s * (1.0 / feat)

    # Two-pass centered variance: numerically robust, same number of
    # cross-lane reductions (2) as the single-pass form.
    d = x - mean
    if feat_pad != feat:
        # Feature axis was zero-padded in the wrapper (only when feat < 128);
        # mask pad lanes so they don't contribute mean^2 to the variance.
        lane = jax.lax.broadcasted_iota(jnp.int32, x.shape, dimension=1)
        d = jnp.where(lane < feat, d, 0.0)

    # torch.std default is the unbiased estimator (ddof=1).
    var = jnp.sum(d * d, axis=-1, keepdims=True) * (1.0 / max(feat - 1, 1))
    std = jnp.sqrt(var)

    # Per-row reciprocal on the narrow (row_tile, 1) column; remaining
    # full-tile work is cheap vmul/vadd (no full-tile divide).
    inv = pl.reciprocal(std + eps, approx=False)

    y = d * (inv * a_ref[...]) + b_ref[...]
    o_ref[...] = y.astype(o_ref.dtype)


def _round_up(x, m):
    return ((x + m - 1) // m) * m


def _sublane(dtype):
    itemsize = jnp.dtype(dtype).itemsize
    if itemsize >= 4:
        return 8
    if itemsize == 2:
        return 16
    return 32


def _vmem_limit_bytes():
    # Per-TensorCore VMEM: 128 MiB on v5e/v6e, 64 MiB on v7x. Raise the scoped
    # limit (default 16/32 MiB) so tiles can saturate HBM bandwidth, applying a
    # single ~25% margin for compiler scratch. Defensively clamp to 64 MiB on
    # anything that isn't clearly v5/v6 in case the query reports per-chip
    # (2 TC x 64 MiB) VMEM on v7x.
    cap = None
    try:
        cap = int(pltpu.get_tpu_info().vmem_capacity_bytes)
    except Exception:
        cap = None
    kind = ""
    try:
        kind = jax.devices()[0].device_kind.lower()
    except Exception:
        pass
    is_v5_v6 = ("v5" in kind) or ("v6" in kind)
    if cap is None:
        cap = 128 * 1024 * 1024 if is_v5_v6 else 64 * 1024 * 1024
    if not is_v5_v6:
        cap = min(cap, 64 * 1024 * 1024)
    return int(min((cap * 3) // 4, 96 * 1024 * 1024))


def _choose_row_tile(rows, feat_pad, dtype, vmem_limit):
    itemsize = jnp.dtype(dtype).itemsize
    # Per row: 2x double-buffered input tile + 2x double-buffered output tile
    # (4 * itemsize) plus the in-kernel f32 working copies of x/y (~ +8 B/elem).
    bytes_per_row = feat_pad * (4 * itemsize + 8)
    fit = max(1, vmem_limit // bytes_per_row)  # VMEM margin already applied once
    # Target ~16 MiB per input tile: long DMAs, amortized ~0.35 us/step overhead.
    target = max(1, (16 * 1024 * 1024) // (feat_pad * itemsize))
    sub = _sublane(dtype)
    tile = min(fit, target)
    # Keep >= ~4 grid blocks so the "parallel" axis can shard across v7x's two
    # TensorCores (harmless on single-TC v5e/v6e).
    tile = min(tile, _round_up(pl.cdiv(rows, 4), sub))
    tile = max(sub, (tile // sub) * sub)
    tile = min(tile, _round_up(rows, sub))
    return int(tile)


def layer_norm(x, a_2, b_2, eps=1e-6, row_tile=None):
    """LayerNorm over the last axis of x. a_2, b_2: shape (features,)."""
    orig_shape = x.shape
    feat = int(orig_shape[-1])
    rows = 1
    for d in orig_shape[:-1]:
        rows *= int(d)

    x2 = x.reshape(rows, feat)
    # Pre-cast gain/bias once outside the kernel (constant index_map -> one DMA).
    a2 = a_2.astype(jnp.float32).reshape(1, feat)
    b2 = b_2.astype(jnp.float32).reshape(1, feat)

    # Only pad the feature axis when it is narrower than one lane group (128).
    # For feat >= 128 the block feature dim equals the full array dim (legal),
    # and a masked final lane-group store is far cheaper than 2 extra HBM passes.
    if feat < _LANE:
        feat_pad = _LANE
        x2 = jnp.pad(x2, ((0, 0), (0, feat_pad - feat)))
        a2 = jnp.pad(a2, ((0, 0), (0, feat_pad - feat)))
        b2 = jnp.pad(b2, ((0, 0), (0, feat_pad - feat)))
    else:
        feat_pad = feat

    vmem_limit = _vmem_limit_bytes()
    if row_tile is None:
        row_tile = _choose_row_tile(rows, feat_pad, x.dtype, vmem_limit)
    else:
        row_tile = int(row_tile)

    kernel = functools.partial(_layernorm_kernel, eps=float(eps),
                               feat=feat, feat_pad=feat_pad)

    # No wrapper-side row padding: partial last block is masked by Pallas
    # (garbage rows stay per-row-confined; their OOB writes are dropped).
    out = pl.pallas_call(
        kernel,
        out_shape=jax.ShapeDtypeStruct((rows, feat_pad), x.dtype),
        grid=(pl.cdiv(rows, row_tile),),
        in_specs=[
            pl.BlockSpec((row_tile, feat_pad), lambda i: (i, 0)),
            pl.BlockSpec((1, feat_pad), lambda i: (0, 0)),
            pl.BlockSpec((1, feat_pad), lambda i: (0, 0)),
        ],
        out_specs=pl.BlockSpec((row_tile, feat_pad), lambda i: (i, 0)),
        compiler_params=pltpu.CompilerParams(
            dimension_semantics=("parallel",),
            vmem_limit_bytes=vmem_limit),
    )(x2, a2, b2)

    if feat_pad != feat:
        out = out[:, :feat]
    return out.reshape(orig_shape)


if __name__ == "__main__":
    def ref_layernorm(x, a, b, eps):
        xf = x.astype(jnp.float32)
        mean = jnp.mean(xf, axis=-1, keepdims=True)
        n = x.shape[-1]
        std = jnp.sqrt(
            jnp.sum((xf - mean) ** 2, axis=-1, keepdims=True) / max(n - 1, 1))
        return (a * (xf - mean) / (std + eps) + b).astype(x.dtype)

    key = jax.random.PRNGKey(0)
    k0, k1, k2, k3, k4, k5 = jax.random.split(key, 6)
    eps = 1e-6

    # 1) Small shape matching the module usage: (batch, seq, hidden), feat < 128.
    batch, seq, hidden = 2, 8, 32
    x = jax.random.normal(k0, (batch, seq, hidden), dtype=jnp.float32)
    a_2 = jnp.ones((hidden,), dtype=jnp.float32)
    b_2 = jnp.zeros((hidden,), dtype=jnp.float32)
    y = jax.block_until_ready(layer_norm(x, a_2, b_2, eps=eps))
    ref = ref_layernorm(x, a_2, b_2, eps)
    assert y.shape == x.shape and y.dtype == x.dtype
    assert jnp.allclose(y, ref, atol=1e-5, rtol=1e-5), "f32 small-F mismatch"

    # 2) Lane-dense features + rows not divisible by the tile (partial-block path).
    b2_, s2_, h2_ = 3, 5, 256
    xb = jax.random.normal(k1, (b2_, s2_, h2_), dtype=jnp.float32)
    ab = jax.random.normal(k2, (h2_,), dtype=jnp.float32)
    bb = jax.random.normal(k3, (h2_,), dtype=jnp.float32)
    yb = jax.block_until_ready(layer_norm(xb, ab, bb, eps=eps))
    assert jnp.allclose(yb, ref_layernorm(xb, ab, bb, eps),
                        atol=1e-4, rtol=1e-4), "f32 lane-dense mismatch"

    # 3) bf16 input path (sublane packing of 16).
    xc = jax.random.normal(k4, (2, 8, 256), dtype=jnp.bfloat16)
    ac = jnp.ones((256,), dtype=jnp.bfloat16)
    bc = jnp.zeros((256,), dtype=jnp.bfloat16)
    yc = jax.block_until_ready(layer_norm(xc, ac, bc, eps=eps))
    refc = ref_layernorm(xc, ac.astype(jnp.float32), bc.astype(jnp.float32), eps)
    assert yc.dtype == xc.dtype
    assert jnp.allclose(yc.astype(jnp.float32), refc.astype(jnp.float32),
                        atol=3e-2, rtol=3e-2), "bf16 mismatch"

    # 4) feat >= 128 but not a multiple of 128 (no wrapper pad; masked lane group).
    h4 = 160
    xd = jax.random.normal(k5, (2, 8, h4), dtype=jnp.float32)
    ad = jnp.ones((h4,), dtype=jnp.float32)
    bd = jnp.zeros((h4,), dtype=jnp.float32)
    yd = jax.block_until_ready(layer_norm(xd, ad, bd, eps=eps))
    assert jnp.allclose(yd, ref_layernorm(xd, ad, bd, eps),
                        atol=1e-4, rtol=1e-4), "f32 non-128-multiple mismatch"

    print("KERNEL_OK")
</pallas_src>

<mosaic_0001>
module attributes {stable_mosaic.version = 11 : i64} {
  func.func @_layernorm_kernel(%arg0: i32, %arg1: memref<8x128xf32, #tpu.memory_space<vmem>>, %arg2: memref<1x128xf32, #tpu.memory_space<vmem>>, %arg3: memref<1x128xf32, #tpu.memory_space<vmem>>, %arg4: memref<8x128xf32, #tpu.memory_space<vmem>>) attributes {dimension_semantics = [#tpu.dimension_semantics<parallel>], iteration_bounds = array<i64: 2>, scalar_prefetch = 0 : i64, scratch_operands = 0 : i64, tpu.core_type = #tpu.core_type<tc>, window_params = [{transform_indices = @transform_0, window_bounds = array<i64: 8, 128>}, {pipeline_mode = #tpu.pipeline_mode<synchronous>, transform_indices = @transform_1, window_bounds = array<i64: 1, 128>}, {pipeline_mode = #tpu.pipeline_mode<synchronous>, transform_indices = @transform_2, window_bounds = array<i64: 1, 128>}, {transform_indices = @transform_3, window_bounds = array<i64: 8, 128>}]} {
    %c0 = arith.constant 0 : index
    %c0_0 = arith.constant 0 : index
    %0 = vector.load %arg1[%c0, %c0_0] : memref<8x128xf32, #tpu.memory_space<vmem>>, vector<8x128xf32>
    %cst = arith.constant dense<0.000000e+00> : vector<8xf32>
    %1 = vector.multi_reduction <add>, %0, %cst [1] : vector<8x128xf32> to vector<8xf32>
    %2 = vector.shape_cast %1 : vector<8xf32> to vector<8x1xf32>
    %cst_1 = arith.constant 3.125000e-02 : f32
    %3 = vector.broadcast %cst_1 : f32 to vector<8x1xf32>
    %4 = arith.mulf %2, %3 : vector<8x1xf32>
    %5 = vector.broadcast %4 : vector<8x1xf32> to vector<8x128xf32>
    %6 = arith.subf %0, %5 : vector<8x128xf32>
    %7 = tpu.iota {dimensions = array<i32: 1>} : vector<8x128xi32>
    %c32_i32 = arith.constant 32 : i32
    %8 = vector.broadcast %c32_i32 : i32 to vector<8x128xi32>
    %9 = arith.cmpi slt, %7, %8 : vector<8x128xi32>
    %cst_2 = arith.constant 0.000000e+00 : f32
    %10 = vector.broadcast %cst_2 : f32 to vector<8x128xf32>
    %11 = arith.select %9, %6, %10 : vector<8x128xi1>, vector<8x128xf32>
    %12 = arith.mulf %11, %11 : vector<8x128xf32>
    %cst_3 = arith.constant dense<0.000000e+00> : vector<8xf32>
    %13 = vector.multi_reduction <add>, %12, %cst_3 [1] : vector<8x128xf32> to vector<8xf32>
    %14 = vector.shape_cast %13 : vector<8xf32> to vector<8x1xf32>
    %cst_4 = arith.constant 0.0322580636 : f32
    %15 = vector.broadcast %cst_4 : f32 to vector<8x1xf32>
    %16 = arith.mulf %14, %15 : vector<8x1xf32>
    %17 = math.sqrt %16 : vector<8x1xf32>
    %cst_5 = arith.constant 9.99999997E-7 : f32
    %18 = vector.broadcast %cst_5 : f32 to vector<8x1xf32>
    %19 = arith.addf %17, %18 : vector<8x1xf32>
    %20 = tpu.reciprocal %19 : vector<8x1xf32> -> vector<8x1xf32>
    %c0_6 = arith.constant 0 : index
    %c0_7 = arith.constant 0 : index
    %21 = vector.load %arg2[%c0_6, %c0_7] : memref<1x128xf32, #tpu.memory_space<vmem>>, vector<1x128xf32>
    %22 = vector.broadcast %20 : vector<8x1xf32> to vector<8x128xf32>
    %23 = vector.broadcast %21 : vector<1x128xf32> to vector<8x128xf32>
    %24 = arith.mulf %22, %23 : vector<8x128xf32>
    %25 = arith.mulf %11, %24 : vector<8x128xf32>
    %c0_8 = arith.constant 0 : index
    %c0_9 = arith.constant 0 : index
    %26 = vector.load %arg3[%c0_8, %c0_9] : memref<1x128xf32, #tpu.memory_space<vmem>>, vector<1x128xf32>
    %27 = vector.broadcast %26 : vector<1x128xf32> to vector<8x128xf32>
    %28 = arith.addf %25, %27 : vector<8x128xf32>
    %c0_10 = arith.constant 0 : index
    %c0_11 = arith.constant 0 : index
    %29 = vector.load %arg4[%c0_10, %c0_11] : memref<8x128xf32, #tpu.memory_space<vmem>>, vector<8x128xf32>
    tpu.vector_store %arg4[%c0_10, %c0_11], %28 {strides = array<i32>} : memref<8x128xf32, #tpu.memory_space<vmem>>, vector<8x128xf32>,
    return
  }
  func.func @transform_0(%arg0: i32) -> (i32, i32) {
    %c0_i32 = arith.constant 0 : i32
    %c0_i32_0 = arith.constant 0 : i32
    return %arg0, %c0_i32 : i32, i32
  }
  func.func @transform_1(%arg0: i32) -> (i32, i32) {
    %c0_i32 = arith.constant 0 : i32
    %c0_i32_0 = arith.constant 0 : i32
    %c0_i32_1 = arith.constant 0 : i32
    return %c0_i32, %c0_i32_0 : i32, i32
  }
  func.func @transform_2(%arg0: i32) -> (i32, i32) {
    %c0_i32 = arith.constant 0 : i32
    %c0_i32_0 = arith.constant 0 : i32
    %c0_i32_1 = arith.constant 0 : i32
    return %c0_i32, %c0_i32_0 : i32, i32
  }
  func.func @transform_3(%arg0: i32) -> (i32, i32) {
    %c0_i32 = arith.constant 0 : i32
    %c0_i32_0 = arith.constant 0 : i32
    return %arg0, %c0_i32 : i32, i32
  }
}

</mosaic_0001>

<bundles_post_ra>
// kernel: tpu_custom_call.1
= control target key start
LH: loop header
LB: loop body
LE: loop exit
PB: predicated region body
PF: predicated region fallthrough
CT: control target
= control target key end

     0   :  { %8 = vsyncpa [#allocation3], 0  ;;  %s641_s0 = inlined_call_operand.hbm [shape: f32[16,128], index: 0, kind: input, shape index: {}]   ;;  %s642_s1 = inlined_call_operand.vmem [shape: f32[1,128], index: 1, kind: input, shape index: {}]   ;;  %s643_s2 = inlined_call_operand.vmem [shape: f32[1,128], index: 2, kind: input, shape index: {}]   ;;  %s644_s3 = inlined_call_operand.hbm [shape: f32[16,128], index: 3, kind: output, shape index: {}]  }
   0x1   :  { %10 = vsyncpa [#allocation3 + $0x1], 0 }
   0x2   :  { %11 = vsyncpa [#allocation4], 0 }
   0x3   :  { %13 = vsyncpa [#allocation4 + $0x1], 0  ;;  %s490_s12 = smov 0   ;;  %s492_s13 = smov 0  }
   0x4   :  { %s494_s14 = smov 0   ;;  %s496_s15 = smov 0  }
   0x5 LB: > { %s511_s16 = sadd.s32 4294967295, %s466_s15   ;;  %s310_s17 = sadd.s32 4294967294, %s466_s15   ;;  %s466_s15 = sphi %s496_s15, %s661_s15   ;;  %s462_s14 = sphi %s494_s14, %s660_s14   ;;  %s458_s13 = sphi %s492_s13, %s659_s13   ;;  %s454_s12 = sphi %s490_s12, %s658_s12  }
   0x6   : > { %s515_s18 = sadd.s32 1, %s466_s15   ;;  %s26_s19 = sadd.s32 1, %s462_s14 }
   0x7   : > { %s23_s20 = ssub.s32 %s466_s15, %s515_s18  ;;  %p33_p0 = scmp.ne.s32.totalorder %s462_s14, %s458_s13 }
   0x8   : > { %p24_p1 = scmp.eq.s32.totalorder %s23_s20, 0  ;;  %p34_p2 = scmp.eq.s32.totalorder %s466_s15, 0 }
   0x9   : > { %p39_p3 = scmp.ne.s32.totalorder %s458_s13, %s454_s12  ;;  %p40_p4 = scmp.eq.s32.totalorder %s511_s16, 0 }
   0xa   : > { %s527_s21 = scalar_select %p24_p1, %s462_s14, %s26_s19  }
   0xb   : > { %p529_p5 = por %p34_p2, %p33_p0  ;;  %p533_p6 = por %p40_p4, %p39_p3 }
   0xc   : > { %p105_p7 = scmp.eq.s32.totalorder %s511_s16, 1  ;;  %p111_p8 = scmp.eq.s32.totalorder %s310_s17, 1 }
   0xd   : > { %s648_s23 = scalar_select %p533_p6, 1, 0 }
   0xe   : > { %p336_p10 = scmp.lt.s32.totalorder %s466_s15, 2  ;;  %p540_p11 = por %p105_p7, %p33_p0 }
   0xf   : > { %p544_p12 = por %p111_p8, %p39_p3  ;;  %s137_s26 = sand.u32 1, %s462_s14  }
  0x10   : > { %s649_s24 = scalar_select %p540_p11, 1, 0 }
  0x11   : > { %s650_s25 = scalar_select %p544_p12, 1, 0 }
  0x12   : > { %s314_s27 = sshll.u32 %s466_s15, 7  ;;  %s313_s28 = sshll.u32 %s137_s26, 3 }
  0x13   : > { %s553_s4 = scalar_lea.hbm %s641_s0, %s314_s27  ;;  %s141_s5 = scalar_lea.vmem [#allocation2], %s313_s28 }
  0x14   : > { %s148_s6 = sshll.u32 %s141_s5, 4  ;;  %p557_p13 = pnand %p336_p10, %p529_p5  ;;  %s561_s6 = int_to_ptr.vmem [resolvable:$true] %s148_s6 }
  0x15   : > { %s138_s8 = scalar_lea.sflag [#allocation3], %s137_s26  ;;  %s374_s9 = scalar_lea.hbm %s553_s4, 128 }
  0x16   : > { %p375_p2 = scmp.ne.s32.totalorder %s553_s4, %s374_s9  ;;  %p376_p3 = pneg %p557_p13 }
  0x17   : > { %s379_s17 = scalar_lea.hbm %s641_s0, 256  ;;  %p380_p5 = scmp.lt.s32.totalorder %s553_s4, %s641_s0 }
  0x18   : > { %p377_p4 = pnand %p376_p3, %p375_p2  ;;  %p381_p8 = scmp.lt.s32.totalorder %s379_s17, %s374_s9 }
  0x1a   : > { %p378_p7 = pneg %p377_p4  ;;  %p382_p10 = por %p381_p8, %p380_p5 }
  0x1c   : > { %p383_p9 = pnand %p382_p10, %p378_p7 }
  0x1e   : > { %386 = shalt.err (!%p383_p9)
}
  0x1f   : > { %s387_s22 = scalar_lea.vmem %s561_s6, 128  ;;  %s468_s26 = smov [#allocation2]  }
  0x20   : > { %p388_p0 = scmp.ne.s32.totalorder %s561_s6, %s387_s22  ;;  %s392_s27 = sshll.u32 %s468_s26, 4  ;;  %s393_s27 = int_to_ptr.vmem [resolvable:$false] %s392_s27 }
  0x21   : > { %s394_s28 = scalar_lea.vmem %s393_s27, 256  ;;  %p395_p4 = scmp.lt.s32.totalorder %s561_s6, %s393_s27 }
  0x22   : > { %p390_p1 = pnand %p388_p0, %p376_p3  ;;  %p396_p12 = scmp.lt.s32.totalorder %s394_s28, %s387_s22 }
  0x24   : > { %p391_p2 = pneg %p390_p1  ;;  %p397_p11 = por %p396_p12, %p395_p4 }
  0x26   : > { %p398_p6 = pnand %p397_p11, %p391_p2 }
  0x28   : > { %401 = shalt.err (!%p398_p6)
}
  0x29   : > { %331 = dma.hbm_to_vmem [thread:$0]  (!%p557_p13), %s553_s4, 128, %s561_s6, %s138_s8  }
  0x2a   : > { %p652_p9 = scmp.lt.s32.totalorder %s466_s15, 3  ;;  %p653_p7 = scmp.ge.s32.totalorder %s466_s15, 1 }
  0x2c   : > { %p154_p0 = pnand %p653_p7, %p652_p9 }
  0x2d   : > { %s588_s29 = sand.u32 (!%p154_p0), 1, %s458_s13   ;;  %p654_p6 = scmp.ne.s32.totalorder (!%p154_p0), %s648_s23, 0 }
  0x2e   : > { %157 = sbr.rel (%p154_p0) target bundleno = 391 (0x187), region = 32  ;;  %s316_s30 = sshll.u32 (!%p154_p0), %s588_s29, 3 }
  0x2f   : > { %s160_s5 = scalar_lea.sflag (!%p154_p0), [#allocation3], %s588_s29  ;;  %s163_s7 = scalar_lea.vmem (!%p154_p0), [#allocation2], %s316_s30 }
  0x33   : > { %445 = dma.done.wait (%p654_p6), %s160_s5, 128  }
  0x34   : > { %447 = vsyncadd (%p654_p6), %s160_s5, 4294967168  ;;  %v186_v0 = vld [vmem:[%s163_s7] sm:$0xff]  ;;  %v191_v1 = vlaneseq  ;;  %s321_s9 = sshll.u32 %s511_s16, 7  ;;  %s185_s10 = scalar_lea.vmem [#allocation5], %s316_s30 }
  0x35   : > { %187 = vadd.xlane.f32.xlu0 %v186_v0  ;;  %v318_v16 = vld [vmem:[%s642_s1] ss:$0 sm:$0xff]  ;;  %s240_s11 = sshll.u32 %s185_s10, 4  ;;  %s238_s20 = scalar_lea.hbm %s644_s3, %s321_s9  ;;  %s241_s11 = int_to_ptr.vmem [resolvable:$true] %s240_s11 }
  0x36   : > { %v192_v2 = vand.u32 127, %v191_v1  ;;  %v319_v19 = vld [vmem:[%s643_s2] ss:$0 sm:$0xff]  ;;  %s227_s22 = scalar_lea.sflag [#allocation4], %s588_s29  ;;  %s402_s26 = scalar_lea.vmem %s241_s11, 128 }
  0x37   : > { %p403_p11 = scmp.ne.s32.totalorder %s241_s11, %s402_s26  ;;  %p655_p12 = scmp.ne.s32.totalorder %s649_s24, 0 }
  0x38   : > { %vm193_vm0 = vcmp.lt.s32.totalorder %v192_v2, 32  ;;  %s469_s27 = smov [#allocation5]  }
  0x39   : > { %p404_p13 = pnand %p403_p11, %p655_p12  ;;  %s406_s28 = sshll.u32 %s469_s27, 4  ;;  %s407_s28 = int_to_ptr.vmem [resolvable:$false] %s406_s28 }
  0x3a   : > { %s408_s16 = scalar_lea.vmem %s407_s28, 256  ;;  %p409_p3 = scmp.lt.s32.totalorder %s241_s11, %s407_s28 }
  0x3b   : > { %p405_p1 = pneg %p404_p13  ;;  %p410_p5 = scmp.lt.s32.totalorder %s408_s16, %s402_s26 }
  0x3d   : > { %p411_p8 = por %p410_p5, %p409_p3 }
  0x3f   : > { %p412_p10 = pnand %p411_p8, %p405_p1 }
  0xbe   : > { %v188_v3 = vpop.xlane.xlu0 %187 }
  0xbf   : > { %v189_v4 = vmul.f32 0.03125, %v188_v3 }
  0xc1   : > { %v190_v5 = vsub.f32 %v186_v0, %v189_v4 }
  0xc3   : > { %v194_v6 = vsel %vm193_vm0, %v190_v5, 0.0 }
  0xc4   : > { %v195_v7 = vmul.f32 %v194_v6, %v194_v6 }
  0xc6   : > { %196 = vadd.xlane.f32.xlu0 %v195_v7 }
 0x14f   : > { %v197_v8 = vpop.xlane.xlu0 %196 }
 0x150   : > { %v198_v9 = vmul.f32 0.032258064, %v197_v8 }
 0x152   : > { %370 = vrsqrt.f32 %v198_v9  ;;  %vm201_vm1 = vcmp.eq.f32.partialorder %v198_v9, inf  ;;  %v204_v12 = vand.u32 2147483648, %v198_v9  ;;  %vm203_vm2 = vcmp.eq.f32.partialorder %v198_v9, 0.0 }
 0x15f   : > { %v371_v10 = vpop.eup %370 }
 0x160   : > { %v200_v11 = vmul.f32 %v371_v10, %v198_v9 }
 0x162   : > { %v202_v13 = vsel %vm201_vm1, %v198_v9, %v200_v11 }
 0x163   : > { %v205_v14 = vsel %vm203_vm2, %v204_v12, %v202_v13 }
 0x164   : > { %v206_v15 = vadd.f32 1e-06, %v205_v14 }
 0x166   : > { %372 = vrcp.f32 %v206_v15 }
 0x173   : > { %v373_v17 = vpop.eup %372 }
 0x174   : > { %v215_v18 = vmul.f32 %v373_v17, %v318_v16 }
 0x176   : > { %v216_v20 = vmul.f32 %v215_v18, %v194_v6 }
 0x178   : > { %v224_v21 = vadd.f32 %v319_v19, %v216_v20 }
 0x17a   : > { %225 = vst [vmem:[%s185_s10] sm:$0xff] %v224_v21 }
 0x17b   : > { %415 = shalt.err (!%p412_p10)
}
 0x17c   : > { %s416_s30 = scalar_lea.hbm %s238_s20, 128  ;;  %s420_s7 = scalar_lea.hbm %s644_s3, 256 }
 0x17d   : > { %p417_p2 = scmp.ne.s32.totalorder %s238_s20, %s416_s30  ;;  %p421_p7 = scmp.lt.s32.totalorder %s238_s20, %s644_s3 }
 0x17e   : > { %p422_p0 = scmp.lt.s32.totalorder %s420_s7, %s416_s30 }
 0x17f   : > { %p418_p4 = pnand %p417_p2, %p655_p12 }
 0x180   : > { %p423_p6 = por %p422_p0, %p421_p7 }
 0x181   : > { %p419_p9 = pneg %p418_p4 }
 0x183   : > { %p424_p11 = pnand %p423_p6, %p419_p9 }
 0x185   : > { %427 = shalt.err (!%p424_p11)
}
 0x186   : > { %326 = dma.vmem_to_hbm [thread:$0]  (%p655_p12), %s241_s11, 128, %s238_s20, %s227_s22  }
 0x187 PF: > { %s252_s6 = sand.u32 1, %s454_s12   ;;  %p656_p13 = scmp.ne.s32.totalorder %s650_s25, 0 }
 0x188   : > { %p657_p1 = scmp.ge.s32.totalorder %s466_s15, 2  ;;  %s253_s8 = scalar_lea.sflag [#allocation4], %s252_s6 }
 0x18a   : > { %p333_p3 = pnand %p657_p1, %p656_p13 }
 0x18c   : > { %p334_p5 = pneg %p333_p3 }
 0x18e   : > { %449 = dma.done.wait (%p334_p5), %s253_s8, 128  }
 0x18f   : > { %451 = vsyncadd (%p334_p5), %s253_s8, 4294967168  ;;  %p16_p8 = scmp.ge.s32.totalorder %s515_s18, 4   ;;  %s658_s12 = smov %s458_s13 }
 0x190   : > { %s659_s13 = smov %s462_s14  ;;  %s660_s14 = smov %s527_s21 }
 0x191   : > { %s661_s15 = smov %s515_s18  ;;  %18 = sbr.rel (!%p16_p8) target bundleno = 5 (0x5), region = 77 }
 0x196   :  { %258 = vsyncpa [#allocation3], 1 }
 0x197   :  { %260 = vsyncpa [#allocation3 + $0x1], 1 }
 0x198   :  { %261 = vsyncpa [#allocation4], 1 }
 0x199   :  { %263 = vsyncpa [#allocation4 + $0x1], 1 }

</bundles_post_ra>
